<compile_context>
chip_gen: v6e
topology: v6e:2x2x1
jax: 0.10.0
libtpu: 0.0.40
codegen_flags: <defaults>
</compile_context>

<pallas_src>
import math

import jax
import jax.numpy as jnp
from jax.experimental import pallas as pl
from jax.experimental.pallas import tpu as pltpu

_LANES = 128
_SUBLANES = 8
_CHUNK_ROWS = 512          # 512 x 128 f32 = 256 KiB upcast temp per inner-loop step


def _round_up(x, m):
    return ((x + m - 1) // m) * m


def _make_partial_sum_kernel(block_rows, chunk_rows):
    """Kernel: accumulate a per-split (8,128) f32 partial sum of a (block_rows,128) tile."""
    n_chunks = block_rows // chunk_rows

    def kernel(x_ref, out_ref):
        @pl.when(pl.program_id(1) == 0)
        def _init():
            out_ref[...] = jnp.zeros_like(out_ref)

        def chunk_sum(start):
            x = x_ref[pl.ds(start, chunk_rows), :].astype(jnp.float32)
            # Fold row groups onto one vreg-shaped accumulator: elementwise VALU adds only
            # (no XLU cross-lane work), fully hidden under the HBM DMA.
            return jnp.sum(x.reshape(-1, _SUBLANES, _LANES), axis=0)

        if n_chunks == 1:
            acc = chunk_sum(0)
        else:
            def body(c, acc):
                start = pl.multiple_of(c * chunk_rows, chunk_rows)
                return acc + chunk_sum(start)

            acc = jax.lax.fori_loop(
                0, n_chunks, body, jnp.zeros((_SUBLANES, _LANES), jnp.float32))

        out_ref[0] += acc

    return kernel


def _tpu_topology():
    """(tensorcores_per_chip, vmem_limit_bytes) inferred from the local device."""
    cores, vmem_limit = 1, 64 * 1024 * 1024           # v5e/v6e: single TC, 128 MiB VMEM
    try:
        kind = jax.devices()[0].device_kind.lower()
    except Exception:
        kind = ""
    if "v7" in kind:                                   # v7x: 2 TCs, 64 MiB VMEM per TC
        cores, vmem_limit = 2, 48 * 1024 * 1024
    return cores, vmem_limit


def _plan_tiling(rows_total, num_splits, block_rows_max, sub):
    """Choose (block_rows, chunk_rows, blocks_per_split) for a given split count."""
    rows_per_split = pl.cdiv(rows_total, num_splits)
    block_rows = min(block_rows_max, max(sub, (rows_per_split // sub) * sub))
    if block_rows > _CHUNK_ROWS:
        block_rows = (block_rows // _CHUNK_ROWS) * _CHUNK_ROWS
        chunk_rows = _CHUNK_ROWS
    else:
        chunk_rows = block_rows
    blocks_per_split = rows_total // (num_splits * block_rows)
    return block_rows, chunk_rows, blocks_per_split


def nice_criterion_loss(prior_h, s, *, average=False, eps=1e-7,
                        block_rows=16384, num_splits=None):
    """Pallas TPU implementation of _NICECriterion.forward(h, s) with prior(h) precomputed.

    prior_h : prior log-density prior(h); any shape/dtype.
    s       : log-scaling term, broadcastable against prior_h (as in the PyTorch module).
    """
    del eps  # unused by _NICECriterion.forward (kept for API parity)
    prior_h = jnp.asarray(prior_h)
    s = jnp.asarray(s)

    # The analytic s decomposition (and the mean divisor) need the full broadcast shape.
    bshape = jnp.broadcast_shapes(prior_h.shape, s.shape)
    if tuple(bshape) != tuple(prior_h.shape):
        prior_h = jnp.broadcast_to(prior_h, bshape)
    n_elems = math.prod(bshape) if bshape else 1

    # sum distributes over +: the broadcast `s` contribution is added analytically, so the
    # kernel never streams a materialized full-size copy of s.
    s_rep = n_elems // max(s.size, 1)
    s_sum = jnp.sum(s.astype(jnp.float32)) * jnp.float32(s_rep)

    itemsize = jnp.dtype(prior_h.dtype).itemsize
    sub = max(_SUBLANES, 32 // itemsize)               # f32: 8, bf16: 16, int8/fp8: 32
    block_rows = _round_up(max(int(block_rows), sub), sub)
    rows_total = n_elems // _LANES
    flat = prior_h.reshape(-1)

    tc_cores, vmem_limit = _tpu_topology()
    if num_splits is None:
        num_splits = tc_cores
    num_splits = max(1, int(num_splits))

    if rows_total:
        blk, chunk, bps = _plan_tiling(rows_total, num_splits, block_rows, sub)
        if bps == 0 and num_splits > 1:
            num_splits = 1                              # splits only help on multi-TC chips
            blk, chunk, bps = _plan_tiling(rows_total, 1, block_rows, sub)
    else:
        blk = chunk = bps = 0

    main_elems = num_splits * bps * blk * _LANES if bps else 0

    total = s_sum
    if main_elems:
        if n_elems % _LANES == 0:
            # Pure metadata reshape: the grid simply never indexes rows past the
            # block-aligned prefix, so no pad / copy of prior_h is ever made.
            x2d = flat.reshape(n_elems // _LANES, _LANES)
        else:
            # Sub-128-ragged total size: slice only the block-aligned prefix (bounded copy).
            x2d = jax.lax.slice(flat, (0,), (main_elems,)).reshape(
                main_elems // _LANES, _LANES)

        kernel = _make_partial_sum_kernel(blk, chunk)
        split_sem = pltpu.PARALLEL if num_splits > 1 else pltpu.ARBITRARY
        # TODO(synk): if profiling on v7x shows the split axis is not sharded across the two
        # TensorCores by PARALLEL, switch it to pltpu.CORE_PARALLEL / pl.core_map.
        cost = pl.CostEstimate(
            flops=int(main_elems),
            transcendentals=0,
            bytes_accessed=int(main_elems * itemsize + num_splits * _SUBLANES * _LANES * 4),
        )
        partials = pl.pallas_call(
            kernel,
            out_shape=jax.ShapeDtypeStruct((num_splits, _SUBLANES, _LANES), jnp.float32),
            grid_spec=pltpu.PrefetchScalarGridSpec(
                num_scalar_prefetch=0,
                grid=(num_splits, bps),
                in_specs=[pl.BlockSpec(
                    (blk, _LANES),
                    lambda p, j, bps=bps: (p * bps + j, 0))],
                out_specs=pl.BlockSpec((1, _SUBLANES, _LANES), lambda p, j: (p, 0, 0)),
            ),
            compiler_params=pltpu.CompilerParams(
                dimension_semantics=(split_sem, pltpu.ARBITRARY),
                vmem_limit_bytes=vmem_limit,
            ),
            cost_estimate=cost,
        )(x2d)
        total = total + jnp.sum(partials)   # tiny (num_splits*8*128)-element reduce

    if main_elems < n_elems:
        # Ragged tail the grid does not cover (< one split-block group + 128 elements):
        # summed by a tiny wrapper-side reduce instead of padding/copying prior_h.
        total = total + jnp.sum(flat[main_elems:].astype(jnp.float32))

    if average:
        return -(total / jnp.float32(n_elems))
    return -total


if __name__ == "__main__":
    key = jax.random.PRNGKey(0)
    k1, k2, k3, k4 = jax.random.split(key, 4)

    # Small NCHW-shaped inputs consistent with a NICE coupling-flow output.
    x_shape = (2, 4, 16, 16)                                       # (B, C, H, W)
    prior_h = jax.random.normal(k1, x_shape, dtype=jnp.float32)    # stands in for prior(h)
    s = jax.random.normal(k2, (2, 1, 1, 1), dtype=jnp.float32)     # per-sample log-scale term

    loss_sum = nice_criterion_loss(prior_h, s, average=False)
    loss_avg = nice_criterion_loss(prior_h, s, average=True)
    jax.block_until_ready((loss_sum, loss_avg))

    # Reference check in plain JAX (materialized broadcast, like the PyTorch module).
    ll = prior_h + s
    assert jnp.allclose(loss_sum, -jnp.sum(ll), rtol=1e-5, atol=1e-4), (loss_sum, -jnp.sum(ll))
    assert jnp.allclose(loss_avg, -jnp.mean(ll), rtol=1e-5, atol=1e-4), (loss_avg, -jnp.mean(ll))

    # Full-shape s (no broadcasting) confirms the analytic decomposition.
    s_full = jax.random.normal(k3, x_shape, dtype=jnp.float32)
    loss_full = nice_criterion_loss(prior_h, s_full, average=False)
    jax.block_until_ready(loss_full)
    assert jnp.allclose(loss_full, -jnp.sum(prior_h + s_full), rtol=1e-5, atol=1e-4)

    # Misaligned / ragged shape exercises the no-pad tail path.
    y_shape = (3, 5, 7, 11)
    prior_h2 = jax.random.normal(k4, y_shape, dtype=jnp.float32)
    s2 = jax.random.normal(k2, (3, 1, 1, 1), dtype=jnp.float32)
    loss2 = nice_criterion_loss(prior_h2, s2, average=True)
    jax.block_until_ready(loss2)
    assert jnp.allclose(loss2, -jnp.mean(prior_h2 + s2), rtol=1e-5, atol=1e-4)

    print("KERNEL_OK")
</pallas_src>

<mosaic_0001>
module attributes {stable_mosaic.version = 11 : i64} {
  func.func @kernel(%arg0: i32, %arg1: i32, %arg2: memref<16x128xf32, #tpu.memory_space<vmem>>, %arg3: memref<1x8x128xf32, #tpu.memory_space<vmem>>) attributes {dimension_semantics = [#tpu.dimension_semantics<arbitrary>, #tpu.dimension_semantics<arbitrary>], iteration_bounds = array<i64: 1, 1>, scalar_prefetch = 0 : i64, scratch_operands = 0 : i64, tpu.core_type = #tpu.core_type<tc>, window_params = [{transform_indices = @transform_0, window_bounds = array<i64: 16, 128>}, {transform_indices = @transform_1, window_bounds = array<i64: 1, 8, 128>}]} {
    %c0_i32 = arith.constant 0 : i32
    %0 = arith.cmpi eq, %arg1, %c0_i32 : i32
    %1 = arith.extui %0 : i1 to i32
    %c0_i32_0 = arith.constant 0 : i32
    %2 = arith.cmpi ne, %1, %c0_i32_0 : i32
    scf.if %2 {
      %cst_8 = arith.constant 0.000000e+00 : f32
      %12 = vector.broadcast %cst_8 : f32 to vector<1x8x128xf32>
      %c0_9 = arith.constant 0 : index
      %c0_10 = arith.constant 0 : index
      %c0_11 = arith.constant 0 : index
      %13 = vector.load %arg3[%c0_9, %c0_10, %c0_11] : memref<1x8x128xf32, #tpu.memory_space<vmem>>, vector<1x8x128xf32>
      tpu.vector_store %arg3[%c0_9, %c0_10, %c0_11], %12 {strides = array<i32>} : memref<1x8x128xf32, #tpu.memory_space<vmem>>, vector<1x8x128xf32>,
    } else {
    }
    %c0 = arith.constant 0 : index
    %c0_1 = arith.constant 0 : index
    %3 = vector.load %arg2[%c0, %c0_1] : memref<16x128xf32, #tpu.memory_space<vmem>>, vector<16x128xf32>
    %4 = vector.shape_cast %3 : vector<16x128xf32> to vector<2x8x128xf32>
    %cst = arith.constant dense<0.000000e+00> : vector<8x128xf32>
    %5 = vector.multi_reduction <add>, %4, %cst [0] : vector<2x8x128xf32> to vector<8x128xf32>
    %c0_2 = arith.constant 0 : index
    %c0_3 = arith.constant 0 : index
    %c0_4 = arith.constant 0 : index
    %6 = vector.load %arg3[%c0_2, %c0_3, %c0_4] : memref<1x8x128xf32, #tpu.memory_space<vmem>>, vector<1x8x128xf32>
    %7 = vector.shape_cast %6 : vector<1x8x128xf32> to vector<8x128xf32>
    %8 = arith.addf %7, %5 : vector<8x128xf32>
    %c0_5 = arith.constant 0 : index
    %c0_6 = arith.constant 0 : index
    %c0_7 = arith.constant 0 : index
    %9 = vector.load %arg3[%c0_5, %c0_6, %c0_7] : memref<1x8x128xf32, #tpu.memory_space<vmem>>, vector<1x8x128xf32>
    %10 = vector.shape_cast %9 : vector<1x8x128xf32> to vector<8x128xf32>
    %11 = vector.shape_cast %8 : vector<8x128xf32> to vector<1x8x128xf32>
    tpu.vector_store %arg3[%c0_5, %c0_6, %c0_7], %11 {strides = array<i32>} : memref<1x8x128xf32, #tpu.memory_space<vmem>>, vector<1x8x128xf32>,
    return
  }
  func.func @transform_0(%arg0: i32, %arg1: i32) -> (i32, i32) {
    %c1_i32 = arith.constant 1 : i32
    %0 = arith.muli %arg0, %c1_i32 : i32
    %1 = arith.addi %0, %arg1 : i32
    %c0_i32 = arith.constant 0 : i32
    %c0_i32_0 = arith.constant 0 : i32
    return %1, %c0_i32 : i32, i32
  }
  func.func @transform_1(%arg0: i32, %arg1: i32) -> (i32, i32, i32) {
    %c0_i32 = arith.constant 0 : i32
    %c0_i32_0 = arith.constant 0 : i32
    %c0_i32_1 = arith.constant 0 : i32
    return %arg0, %c0_i32, %c0_i32_0 : i32, i32, i32
  }
}

</mosaic_0001>

<bundles_post_ra>
// kernel: tpu_custom_call.1
= control target key start
LH: loop header
LB: loop body
LE: loop exit
PB: predicated region body
PF: predicated region fallthrough
CT: control target
= control target key end

     0   :  { %6 = vsyncpa [#allocation3], 0  ;;  %s124_s0 = inlined_call_operand.hbm [shape: f32[16,128], index: 0, kind: input, shape index: {}]   ;;  %s125_s1 = inlined_call_operand.hbm [shape: f32[1,8,128], index: 1, kind: output, shape index: {}]  }
   0x1   :  { %7 = vsyncpa [#allocation4], 0  ;;  %s104_s6 = smov [#allocation2]  }
   0x2   :  { %s17_s7 = sshll.u32 %s104_s6, 4  ;;  %s18_s7 = int_to_ptr.vmem [resolvable:$true] %s17_s7 }
   0x3   :  { %s68_s8 = scalar_lea.vmem %s18_s7, 256  ;;  %p73_p1 = scmp.lt.s32.totalorder %s18_s7, %s18_s7 }
   0x4   :  { %p69_p0 = scmp.ne.s32.totalorder %s18_s7, %s68_s8  ;;  %p74_p2 = scmp.lt.s32.totalorder %s68_s8, %s68_s8 }
   0x6   :  { %p75_p3 = por %p74_p2, %p73_p1 }
   0x8   :  { %p76_p4 = pnand %p75_p3, %p69_p0 }
   0xa   :  { %79 = shalt.err (!%p76_p4)
}
   0xb   :  { %s105_s9 = smov 128   ;;  %s106_s10 = smov 8  }
   0xc   :  { %23 = dma.hbm_to_vmem [thread:$0]  %s124_s0, 256, %s18_s7, [#allocation3], %s105_s9, %s105_s9, %s106_s10  }
   0xd   :  { %100 = dma.done.wait [#allocation3], 256  }
   0xe   :  { %101 = vsyncadd [#allocation3], 4294967040  ;;  %v34_v0 = vld [vmem:[#allocation2] sm:$0xff]  ;;  %v35_v1 = vld [vmem:[#allocation2 + $0x8] sm:$0xff]  ;;  %s107_s13 = smov [#allocation5]  }
   0xf   :  { %s46_s14 = sshll.u32 %s107_s13, 4  ;;  %v36_v2 = vadd.f32 %v35_v1, %v34_v0  ;;  %s47_s14 = int_to_ptr.vmem [resolvable:$true] %s46_s14 }
  0x10   :  { %s80_s15 = scalar_lea.vmem %s47_s14, 128  ;;  %p85_p6 = scmp.lt.s32.totalorder %s47_s14, %s47_s14 }
  0x11   :  { %39 = vst [vmem:[#allocation5] sm:$0xff] %v36_v2  ;;  %p81_p5 = scmp.ne.s32.totalorder %s47_s14, %s80_s15  ;;  %p86_p7 = scmp.lt.s32.totalorder %s80_s15, %s80_s15 }
  0x13   :  { %p87_p8 = por %p86_p7, %p85_p6 }
  0x15   :  { %p88_p9 = pnand %p87_p8, %p81_p5 }
  0x17   :  { %91 = shalt.err (!%p88_p9)
}
  0x18   :  { %49 = dma.vmem_to_hbm [thread:$0]  %s47_s14, 128, %s125_s1, [#allocation4]  }
  0x19   :  { %102 = dma.done.wait [#allocation4], 128  }
  0x1a   :  { %103 = vsyncadd [#allocation4], 4294967168 }
  0x1b   :  { %53 = vsyncpa [#allocation3], 1 }
  0x1c   :  { %54 = vsyncpa [#allocation4], 1 }

</bundles_post_ra>
